<compile_context>
chip_gen: v5e
topology: v5e:2x2
jax: 0.10.0
libtpu: 0.0.40
codegen_flags: <defaults>
</compile_context>

<pallas_src>
import functools

import jax
import jax.numpy as jnp
from jax.experimental import pallas as pl
from jax.experimental.pallas import tpu as pltpu

BN_EPS = 1e-5
TK_MAX = 1152          # K tile for the fallback GEMM path (multiple of 128)
TH_MAX = 32            # max output rows per grid step in the fused 3x3 conv kernel


def _device_kind():
    try:
        return jax.devices()[0].device_kind.lower()
    except Exception:
        return ""


_KIND = _device_kind()
if "v6" in _KIND:                       # 128 MiB VMEM, ~1.4 TB/s HBM
    VMEM_LIMIT = 96 * 1024 * 1024
    M_TILE_TARGET = 8192
    TM_MAX = 1024
elif "v5" in _KIND:                     # 128 MiB VMEM, lowest HBM BW
    VMEM_LIMIT = 96 * 1024 * 1024
    M_TILE_TARGET = 4096
    TM_MAX = 512
elif "v7" in _KIND:                     # 64 MiB VMEM per TensorCore
    VMEM_LIMIT = 48 * 1024 * 1024
    M_TILE_TARGET = 4096
    TM_MAX = 512
else:                                   # unknown / older generation: stay safe
    VMEM_LIMIT = None
    M_TILE_TARGET = 4096
    TM_MAX = 512


def _vmem_kw():
    return {} if VMEM_LIMIT is None else {"vmem_limit_bytes": VMEM_LIMIT}


def _round_up(x, m):
    return (x + m - 1) // m * m


def _pick_th(ho, wp):
    """Largest divisor of ho with th <= TH_MAX and th * wp <= M_TILE_TARGET."""
    limit = min(TH_MAX, max(1, M_TILE_TARGET // max(wp, 1)), ho)
    best = 1
    for t in range(1, limit + 1):
        if ho % t == 0:
            best = t
    return best


def _choose_tm(m):
    if m >= 2 * TM_MAX:
        return TM_MAX
    if m > 256:                      # split so both v7x TensorCores get work
        return _round_up((m + 1) // 2, 8)
    return _round_up(m, 8)


def _choose_tk(k):
    """Pick K tile: full K when it is not a multiple of 128, else a <=TK_MAX divisor."""
    if k % 128 != 0 or k <= TK_MAX:
        return k
    best = 128
    for d in range(128, TK_MAX + 1, 128):
        if k % d == 0:
            best = d
    return best


# ---------------------------------------------------------------------------
# Path 1: fused 3x3 stride-1 conv kernel (in-kernel im2col, BN + residual + ReLU)
# ---------------------------------------------------------------------------
def _conv3x3_kernel(*refs, th, wo, wp, d, relu, has_res):
    if has_res:
        x_ref, w_ref, s_ref, b_ref, r_ref, o_ref = refs
    else:
        x_ref, w_ref, s_ref, b_ref, o_ref = refs
        r_ref = None

    m = th * wp
    acc = None
    # im2col is done here: each 3x3 tap is a contiguous slice of the flattened
    # (rows x padded-width) slab resident in VMEM -> 9 MXU dots, f32 accumulation.
    for i in range(3):
        for j in range(3):
            start = i * d * wp + j * d
            tap = x_ref[0, 0, start:start + m, :]                 # (th*wp, Cin) bf16
            part = jnp.dot(tap, w_ref[3 * i + j],
                           preferred_element_type=jnp.float32)    # (th*wp, Cout) f32
            acc = part if acc is None else acc + part

    y = acc * s_ref[...] + b_ref[...]                             # folded BN affine
    for r in range(th):
        row = y[r * wp:r * wp + wo, :]                            # drop pad columns
        if has_res:
            row = row + r_ref[0, r].astype(jnp.float32)
        if relu:
            row = jnp.maximum(row, 0.0)
        o_ref[0, r] = row.astype(o_ref.dtype)


def conv3x3_s1_bn(x, p, *, dilation=1, relu=True, residual=None):
    """3x3 stride-1 conv (padding == dilation) + folded BN + (residual) + ReLU."""
    N, H, W, C = x.shape
    d = dilation
    Ho, Wo = H, W
    Wp = W + 2 * d
    Cout = p["w"].shape[-1]

    xb = x.astype(jnp.bfloat16)
    # pad: d on top/left/right, d+1 at the bottom (one extra row so the flattened
    # tap windows of the last row tile never run out of the slab).
    xp = jnp.pad(xb, ((0, 0), (d, d + 1), (d, d), (0, 0)))

    th = _pick_th(Ho, Wp)
    R = Ho // th
    rows_per_tile = th + 2 * d + 1
    L = rows_per_tile * Wp
    xt = jnp.stack([xp[:, r * th: r * th + rows_per_tile] for r in range(R)], axis=1)
    xt = xt.reshape(N, R, L, C)

    has_res = residual is not None
    args = [xt, p["w"], p["scale"], p["bias"]]
    in_specs = [
        pl.BlockSpec((1, 1, L, C), lambda n, r: (n, r, 0, 0)),       # activation slab
        pl.BlockSpec((9, C, Cout), lambda n, r: (0, 0, 0)),          # VMEM-resident w
        pl.BlockSpec((1, Cout), lambda n, r: (0, 0)),
        pl.BlockSpec((1, Cout), lambda n, r: (0, 0)),
    ]
    if has_res:
        args.append(residual.astype(jnp.bfloat16))
        in_specs.append(pl.BlockSpec((1, th, Wo, Cout), lambda n, r: (n, r, 0, 0)))

    kernel = functools.partial(_conv3x3_kernel, th=th, wo=Wo, wp=Wp, d=d,
                               relu=relu, has_res=has_res)
    flops = 2 * N * R * (th * Wp) * (9 * C) * Cout
    bytes_acc = (xt.size * 2 + p["w"].size * 2 + 8 * Cout
                 + N * Ho * Wo * Cout * 2 * (2 if has_res else 1))

    return pl.pallas_call(
        kernel,
        out_shape=jax.ShapeDtypeStruct((N, Ho, Wo, Cout), jnp.bfloat16),
        grid_spec=pltpu.PrefetchScalarGridSpec(
            num_scalar_prefetch=0,
            grid=(N, R),
            in_specs=in_specs,
            out_specs=pl.BlockSpec((1, th, Wo, Cout), lambda n, r: (n, r, 0, 0)),
        ),
        compiler_params=pltpu.CompilerParams(
            dimension_semantics=("parallel", "parallel"), **_vmem_kw()),
        cost_estimate=pl.CostEstimate(flops=int(flops), transcendentals=0,
                                      bytes_accessed=int(bytes_acc)),
    )(*args)


# ---------------------------------------------------------------------------
# Path 2: GEMM kernel for the two stride-2 3x3 convs and the 1x1 downsample convs
# ---------------------------------------------------------------------------
def _gemm_bn_kernel(x_ref, w_ref, s_ref, b_ref, o_ref, acc_ref, *, relu):
    t = pl.program_id(1)

    @pl.when(t == 0)
    def _():
        acc_ref[...] = jnp.zeros_like(acc_ref)

    acc_ref[...] += jnp.dot(x_ref[...], w_ref[0], preferred_element_type=jnp.float32)

    @pl.when(t == pl.num_programs(1) - 1)
    def _():
        y = acc_ref[...] * s_ref[...] + b_ref[...]
        if relu:
            y = jnp.maximum(y, 0.0)
        o_ref[...] = y.astype(o_ref.dtype)


def _gemm_bn(cols, w2d, scale, bias, *, relu):
    """cols: [M, K] bf16; w2d: [K, Cout] bf16; scale/bias: [1, Cout] f32 -> bf16 out."""
    M, K = cols.shape
    Cout = w2d.shape[1]
    tm = _choose_tm(M)
    Mp = _round_up(M, tm)
    if Mp != M:
        cols = jnp.pad(cols, ((0, Mp - M), (0, 0)))
    tk = _choose_tk(K)
    nk = K // tk
    w3 = w2d.reshape(nk, tk, Cout)

    out = pl.pallas_call(
        functools.partial(_gemm_bn_kernel, relu=relu),
        out_shape=jax.ShapeDtypeStruct((Mp, Cout), jnp.bfloat16),
        grid_spec=pltpu.PrefetchScalarGridSpec(
            num_scalar_prefetch=0,
            grid=(Mp // tm, nk),
            in_specs=[
                pl.BlockSpec((tm, tk), lambda i, t: (i, t)),
                pl.BlockSpec((1, tk, Cout), lambda i, t: (t, 0, 0)),  # one K-slab only
                pl.BlockSpec((1, Cout), lambda i, t: (0, 0)),
                pl.BlockSpec((1, Cout), lambda i, t: (0, 0)),
            ],
            out_specs=pl.BlockSpec((tm, Cout), lambda i, t: (i, 0)),
            scratch_shapes=[pltpu.VMEM((tm, Cout), jnp.float32)],
        ),
        compiler_params=pltpu.CompilerParams(
            dimension_semantics=("parallel", "arbitrary"), **_vmem_kw()),
        cost_estimate=pl.CostEstimate(
            flops=2 * Mp * K * Cout, transcendentals=0,
            bytes_accessed=int(cols.size * 2 + w2d.size * 2 + Mp * Cout * 2 + 8 * Cout)),
    )(cols, w3, scale, bias)
    return out[:M]


def im2col(x, k, stride, dilation, padding):
    """x: [N, H, W, C] -> (cols [N*Ho*Wo, k*k*C], (N, Ho, Wo)). Used for stride-2 3x3."""
    N, H, W, C = x.shape
    Ho = (H + 2 * padding - dilation * (k - 1) - 1) // stride + 1
    Wo = (W + 2 * padding - dilation * (k - 1) - 1) // stride + 1
    xp = jnp.pad(x, ((0, 0), (padding, padding), (padding, padding), (0, 0)))
    taps = []
    for i in range(k):
        for j in range(k):
            hs = i * dilation
            ws = j * dilation
            sl = xp[:, hs:hs + stride * (Ho - 1) + 1:stride,
                    ws:ws + stride * (Wo - 1) + 1:stride, :]
            taps.append(sl.reshape(N * Ho * Wo, C))
    return jnp.concatenate(taps, axis=-1), (N, Ho, Wo)


# ---------------------------------------------------------------------------
# Conv dispatcher + blocks + params
# ---------------------------------------------------------------------------
def conv_bn(x, p, *, k, stride=1, dilation=1, padding=0, relu=True, residual=None):
    if k == 3 and stride == 1:
        assert padding == dilation
        return conv3x3_s1_bn(x, p, dilation=dilation, relu=relu, residual=residual)

    assert residual is None
    N, H, W, C = x.shape
    xb = x.astype(jnp.bfloat16)
    if k == 1:
        if stride != 1:
            xb = xb[:, ::stride, ::stride, :]
        _, Ho, Wo, _ = xb.shape
        cols = xb.reshape(N * Ho * Wo, C)
        w2d = p["w"].reshape(C, -1)
    else:
        cols, (N, Ho, Wo) = im2col(xb, k, stride, dilation, padding)
        w2d = p["w"].reshape(k * k * C, -1)
    Cout = w2d.shape[1]
    out = _gemm_bn(cols, w2d, p["scale"], p["bias"], relu=relu)
    return out.reshape(N, Ho, Wo, Cout)


def maxpool(x, *, k=3, stride=2, padding=1):
    # TODO(synk): XLA reduce_window (bf16) instead of a fused Pallas maxpool kernel.
    return jax.lax.reduce_window(
        x, jnp.asarray(-jnp.inf, x.dtype), jax.lax.max,
        window_dimensions=(1, k, k, 1),
        window_strides=(1, stride, stride, 1),
        padding=[(0, 0), (padding, padding), (padding, padding), (0, 0)])


def basic_block(x, p, *, conv1_stride=1, conv2_dilation=1, down_stride=None):
    identity = x
    out = conv_bn(x, p["conv1"], k=3, stride=conv1_stride, dilation=1, padding=1,
                  relu=True)
    if "down" in p:
        identity = conv_bn(x, p["down"], k=1, stride=down_stride, dilation=1,
                           padding=0, relu=False)
    out = conv_bn(out, p["conv2"], k=3, stride=1, dilation=conv2_dilation,
                  padding=conv2_dilation, relu=True, residual=identity)
    return out


def init_conv_bn(key, cin, cout, k):
    fan_out = k * k * cout
    std = (2.0 / fan_out) ** 0.5  # kaiming_normal_(mode='fan_out', nonlinearity='relu')
    w = jax.random.normal(key, (k * k, cin, cout), jnp.float32) * std
    gamma = jnp.ones((cout,), jnp.float32)
    beta = jnp.zeros((cout,), jnp.float32)
    mean = jnp.zeros((cout,), jnp.float32)
    var = jnp.ones((cout,), jnp.float32)
    scale = gamma / jnp.sqrt(var + BN_EPS)
    bias = beta - mean * scale
    return {"w": w.astype(jnp.bfloat16),
            "scale": scale.reshape(1, cout),
            "bias": bias.reshape(1, cout)}


def init_basic_block(key, cin, cout, has_down):
    ks = jax.random.split(key, 3)
    p = {"conv1": init_conv_bn(ks[0], cin, cout, 3),
         "conv2": init_conv_bn(ks[1], cout, cout, 3)}
    if has_down:
        p["down"] = init_conv_bn(ks[2], cin, cout, 1)
    return p


def init_params(key):
    ks = jax.random.split(key, 10)
    return {
        "conv1": init_conv_bn(ks[0], 3, 64, 3),     # monodepth head conv1 (3x3 s1)
        "conv2": init_conv_bn(ks[1], 64, 64, 3),
        "layer1": [init_basic_block(ks[2], 64, 64, False),
                   init_basic_block(ks[3], 64, 64, False)],
        "layer2": [init_basic_block(ks[4], 64, 128, True),
                   init_basic_block(ks[5], 128, 128, False)],
        "layer3": [init_basic_block(ks[6], 128, 256, True),
                   init_basic_block(ks[7], 256, 256, False)],
        "layer4": [init_basic_block(ks[8], 256, 512, True),
                   init_basic_block(ks[9], 512, 512, False)],
    }


def resnet_encoder_forward(params, input_image_nchw):
    """Mirrors ResnetEncoder.forward (num_layers=18): returns the 3 appended features."""
    x = jnp.transpose(input_image_nchw, (0, 2, 3, 1)).astype(jnp.float32)  # NCHW->NHWC
    x = (x - 0.45) / 0.225
    x = conv_bn(x, params["conv1"], k=3, stride=1, dilation=1, padding=1, relu=True)
    x = conv_bn(x, params["conv2"], k=3, stride=1, dilation=1, padding=1, relu=True)
    x = maxpool(x)

    # layer1 (stride 1)
    x = basic_block(x, params["layer1"][0])
    x = basic_block(x, params["layer1"][1])
    f1 = x

    # layer2 (first block stride 2 + downsample)
    x = basic_block(x, params["layer2"][0], conv1_stride=2, down_stride=2)
    x = basic_block(x, params["layer2"][1])
    f2 = x

    # layer3 (monodepth mods: conv1 stride 1, conv2 dilation 2 pad 2, downsample stride 1)
    x = basic_block(x, params["layer3"][0], conv1_stride=1, conv2_dilation=2, down_stride=1)
    x = basic_block(x, params["layer3"][1], conv2_dilation=2)

    # layer4 (mods: conv2 dilation 2 pad 2; conv1 / downsample keep stride 2)
    x = basic_block(x, params["layer4"][0], conv1_stride=2, conv2_dilation=2, down_stride=2)
    x = basic_block(x, params["layer4"][1], conv2_dilation=2)
    f3 = x

    to_nchw = lambda a: jnp.transpose(a.astype(jnp.float32), (0, 3, 1, 2))
    return [to_nchw(f1), to_nchw(f2), to_nchw(f3)]


# ---------------------------------------------------------------------------
# Small numerical self-checks against lax.conv (same bf16-cast inputs)
# ---------------------------------------------------------------------------
def _conv_ref(x, p, k, stride, dilation, padding, relu, residual=None):
    cin = x.shape[-1]
    w = p["w"].astype(jnp.float32).reshape(k, k, cin, -1)
    y = jax.lax.conv_general_dilated(
        x, w, (stride, stride), ((padding, padding), (padding, padding)),
        rhs_dilation=(dilation, dilation),
        dimension_numbers=("NHWC", "HWIO", "NHWC"))
    y = y * p["scale"].reshape(1, 1, 1, -1) + p["bias"].reshape(1, 1, 1, -1)
    if residual is not None:
        y = y + residual
    if relu:
        y = jnp.maximum(y, 0.0)
    return y


def _self_check(key):
    cases = [
        # (cin, cout, k, stride, dilation, with_residual, hw)
        (32, 48, 3, 1, 1, False, 8),
        (24, 64, 3, 1, 2, True, 8),     # dilation-2 fused path
        (16, 32, 3, 1, 1, True, 40),    # multiple row tiles per image
        (16, 32, 3, 2, 1, False, 8),    # stride-2 -> im2col GEMM path
        (16, 32, 1, 2, 1, False, 8),    # 1x1 downsample path
    ]
    for idx, (cin, cout, k, stride, dil, with_res, hw) in enumerate(cases):
        kx, kw, kr = jax.random.split(jax.random.fold_in(key, idx), 3)
        x = jax.random.normal(kx, (1, hw, hw, cin), jnp.float32)
        p = init_conv_bn(kw, cin, cout, k)
        pad = dil if k == 3 else 0
        ho = (hw + 2 * pad - dil * (k - 1) - 1) // stride + 1
        res = jax.random.normal(kr, (1, ho, ho, cout), jnp.float32) if with_res else None
        out = conv_bn(x, p, k=k, stride=stride, dilation=dil, padding=pad,
                      relu=True, residual=res).astype(jnp.float32)
        xq = x.astype(jnp.bfloat16).astype(jnp.float32)
        rq = None if res is None else res.astype(jnp.bfloat16).astype(jnp.float32)
        ref = _conv_ref(xq, p, k, stride, dil, pad, True, rq)
        err = float(jnp.max(jnp.abs(out - ref)))
        bound = 0.03 * float(jnp.max(jnp.abs(ref))) + 0.03
        assert err <= bound, (idx, err, bound)


if __name__ == "__main__":
    key = jax.random.PRNGKey(0)
    kp, kx, kc = jax.random.split(key, 3)

    _self_check(kc)

    params = init_params(kp)
    # PyTorch-style NCHW input (conv1 expects 3 input channels).
    input_image = jax.random.uniform(kx, (2, 3, 16, 16), jnp.float32)

    fwd = jax.jit(resnet_encoder_forward)
    feats = jax.block_until_ready(fwd(params, input_image))

    assert feats[0].shape == (2, 64, 8, 8)
    assert feats[1].shape == (2, 128, 4, 4)
    assert feats[2].shape == (2, 512, 2, 2)
    assert all(bool(jnp.all(jnp.isfinite(f))) for f in feats)
    print("KERNEL_OK")
</pallas_src>

<mosaic_0001>
module attributes {stable_mosaic.version = 11 : i64} {
  func.func @_conv3x3_kernel(%arg0: i32, %arg1: i32, %arg2: memref<1x1x110x32xbf16, #tpu.memory_space<vmem>>, %arg3: memref<9x32x48xbf16, #tpu.memory_space<vmem>>, %arg4: memref<1x48xf32, #tpu.memory_space<vmem>>, %arg5: memref<1x48xf32, #tpu.memory_space<vmem>>, %arg6: memref<1x8x8x48xbf16, #tpu.memory_space<vmem>>) attributes {dimension_semantics = [#tpu.dimension_semantics<parallel>, #tpu.dimension_semantics<parallel>], iteration_bounds = array<i64: 1, 1>, scalar_prefetch = 0 : i64, scratch_operands = 0 : i64, tpu.core_type = #tpu.core_type<tc>, window_params = [{transform_indices = @transform_0, window_bounds = array<i64: 1, 1, 110, 32>}, {pipeline_mode = #tpu.pipeline_mode<synchronous>, transform_indices = @transform_1, window_bounds = array<i64: 9, 32, 48>}, {pipeline_mode = #tpu.pipeline_mode<synchronous>, transform_indices = @transform_2, window_bounds = array<i64: 1, 48>}, {pipeline_mode = #tpu.pipeline_mode<synchronous>, transform_indices = @transform_3, window_bounds = array<i64: 1, 48>}, {transform_indices = @transform_4, window_bounds = array<i64: 1, 8, 8, 48>}]} {
    %c0 = arith.constant 0 : index
    %c0_0 = arith.constant 0 : index
    %c0_1 = arith.constant 0 : index
    %c0_2 = arith.constant 0 : index
    %0 = vector.load %arg2[%c0, %c0_0, %c0_1, %c0_2] : memref<1x1x110x32xbf16, #tpu.memory_space<vmem>>, vector<1x1x80x32xbf16>
    %1 = vector.shape_cast %0 : vector<1x1x80x32xbf16> to vector<80x32xbf16>
    %c0_3 = arith.constant 0 : index
    %c0_4 = arith.constant 0 : index
    %c0_5 = arith.constant 0 : index
    %2 = vector.load %arg3[%c0_3, %c0_4, %c0_5] : memref<9x32x48xbf16, #tpu.memory_space<vmem>>, vector<1x32x48xbf16>
    %3 = vector.shape_cast %2 : vector<1x32x48xbf16> to vector<32x48xbf16>
    %cst = arith.constant dense<0.000000e+00> : vector<80x48xf32>
    %4 = tpu.matmul %1, %3, %cst {dimension_numbers = #tpu.dot_dimension_numbers<[1], [0], [0], [1], [0, 0, 1, 1], [], []>} : vector<80x32xbf16>, vector<32x48xbf16>, vector<80x48xf32> -> vector<80x48xf32>
    %c0_6 = arith.constant 0 : index
    %c0_7 = arith.constant 0 : index
    %c1 = arith.constant 1 : index
    %c0_8 = arith.constant 0 : index
    %5 = vector.load %arg2[%c0_6, %c0_7, %c1, %c0_8] : memref<1x1x110x32xbf16, #tpu.memory_space<vmem>>, vector<1x1x80x32xbf16>
    %6 = vector.shape_cast %5 : vector<1x1x80x32xbf16> to vector<80x32xbf16>
    %c1_9 = arith.constant 1 : index
    %c0_10 = arith.constant 0 : index
    %c0_11 = arith.constant 0 : index
    %7 = vector.load %arg3[%c1_9, %c0_10, %c0_11] : memref<9x32x48xbf16, #tpu.memory_space<vmem>>, vector<1x32x48xbf16>
    %8 = vector.shape_cast %7 : vector<1x32x48xbf16> to vector<32x48xbf16>
    %cst_12 = arith.constant dense<0.000000e+00> : vector<80x48xf32>
    %9 = tpu.matmul %6, %8, %cst_12 {dimension_numbers = #tpu.dot_dimension_numbers<[1], [0], [0], [1], [0, 0, 1, 1], [], []>} : vector<80x32xbf16>, vector<32x48xbf16>, vector<80x48xf32> -> vector<80x48xf32>
    %10 = arith.addf %4, %9 : vector<80x48xf32>
    %c0_13 = arith.constant 0 : index
    %c0_14 = arith.constant 0 : index
    %c2 = arith.constant 2 : index
    %c0_15 = arith.constant 0 : index
    %11 = vector.load %arg2[%c0_13, %c0_14, %c2, %c0_15] : memref<1x1x110x32xbf16, #tpu.memory_space<vmem>>, vector<1x1x80x32xbf16>
    %12 = vector.shape_cast %11 : vector<1x1x80x32xbf16> to vector<80x32xbf16>
    %c2_16 = arith.constant 2 : index
    %c0_17 = arith.constant 0 : index
    %c0_18 = arith.constant 0 : index
    %13 = vector.load %arg3[%c2_16, %c0_17, %c0_18] : memref<9x32x48xbf16, #tpu.memory_space<vmem>>, vector<1x32x48xbf16>
    %14 = vector.shape_cast %13 : vector<1x32x48xbf16> to vector<32x48xbf16>
    %cst_19 = arith.constant dense<0.000000e+00> : vector<80x48xf32>
    %15 = tpu.matmul %12, %14, %cst_19 {dimension_numbers = #tpu.dot_dimension_numbers<[1], [0], [0], [1], [0, 0, 1, 1], [], []>} : vector<80x32xbf16>, vector<32x48xbf16>, vector<80x48xf32> -> vector<80x48xf32>
    %16 = arith.addf %10, %15 : vector<80x48xf32>
    %c0_20 = arith.constant 0 : index
    %c0_21 = arith.constant 0 : index
    %c10 = arith.constant 10 : index
    %c0_22 = arith.constant 0 : index
    %17 = vector.load %arg2[%c0_20, %c0_21, %c10, %c0_22] : memref<1x1x110x32xbf16, #tpu.memory_space<vmem>>, vector<1x1x80x32xbf16>
    %18 = vector.shape_cast %17 : vector<1x1x80x32xbf16> to vector<80x32xbf16>
    %c3 = arith.constant 3 : index
    %c0_23 = arith.constant 0 : index
    %c0_24 = arith.constant 0 : index
    %19 = vector.load %arg3[%c3, %c0_23, %c0_24] : memref<9x32x48xbf16, #tpu.memory_space<vmem>>, vector<1x32x48xbf16>
    %20 = vector.shape_cast %19 : vector<1x32x48xbf16> to vector<32x48xbf16>
    %cst_25 = arith.constant dense<0.000000e+00> : vector<80x48xf32>
    %21 = tpu.matmul %18, %20, %cst_25 {dimension_numbers = #tpu.dot_dimension_numbers<[1], [0], [0], [1], [0, 0, 1, 1], [], []>} : vector<80x32xbf16>, vector<32x48xbf16>, vector<80x48xf32> -> vector<80x48xf32>
    %22 = arith.addf %16, %21 : vector<80x48xf32>
    %c0_26 = arith.constant 0 : index
    %c0_27 = arith.constant 0 : index
    %c11 = arith.constant 11 : index
    %c0_28 = arith.constant 0 : index
    %23 = vector.load %arg2[%c0_26, %c0_27, %c11, %c0_28] : memref<1x1x110x32xbf16, #tpu.memory_space<vmem>>, vector<1x1x80x32xbf16>
    %24 = vector.shape_cast %23 : vector<1x1x80x32xbf16> to vector<80x32xbf16>
    %c4 = arith.constant 4 : index
    %c0_29 = arith.constant 0 : index
    %c0_30 = arith.constant 0 : index
    %25 = vector.load %arg3[%c4, %c0_29, %c0_30] : memref<9x32x48xbf16, #tpu.memory_space<vmem>>, vector<1x32x48xbf16>
    %26 = vector.shape_cast %25 : vector<1x32x48xbf16> to vector<32x48xbf16>
    %cst_31 = arith.constant dense<0.000000e+00> : vector<80x48xf32>
    %27 = tpu.matmul %24, %26, %cst_31 {dimension_numbers = #tpu.dot_dimension_numbers<[1], [0], [0], [1], [0, 0, 1, 1], [], []>} : vector<80x32xbf16>, vector<32x48xbf16>, vector<80x48xf32> -> vector<80x48xf32>
    %28 = arith.addf %22, %27 : vector<80x48xf32>
    %c0_32 = arith.constant 0 : index
    %c0_33 = arith.constant 0 : index
    %c12 = arith.constant 12 : index
    %c0_34 = arith.constant 0 : index
    %29 = vector.load %arg2[%c0_32, %c0_33, %c12, %c0_34] : memref<1x1x110x32xbf16, #tpu.memory_space<vmem>>, vector<1x1x80x32xbf16>
    %30 = vector.shape_cast %29 : vector<1x1x80x32xbf16> to vector<80x32xbf16>
    %c5 = arith.constant 5 : index
    %c0_35 = arith.constant 0 : index
    %c0_36 = arith.constant 0 : index
    %31 = vector.load %arg3[%c5, %c0_35, %c0_36] : memref<9x32x48xbf16, #tpu.memory_space<vmem>>, vector<1x32x48xbf16>
    %32 = vector.shape_cast %31 : vector<1x32x48xbf16> to vector<32x48xbf16>
    %cst_37 = arith.constant dense<0.000000e+00> : vector<80x48xf32>
    %33 = tpu.matmul %30, %32, %cst_37 {dimension_numbers = #tpu.dot_dimension_numbers<[1], [0], [0], [1], [0, 0, 1, 1], [], []>} : vector<80x32xbf16>, vector<32x48xbf16>, vector<80x48xf32> -> vector<80x48xf32>
    %34 = arith.addf %28, %33 : vector<80x48xf32>
    %c0_38 = arith.constant 0 : index
    %c0_39 = arith.constant 0 : index
    %c20 = arith.constant 20 : index
    %c0_40 = arith.constant 0 : index
    %35 = vector.load %arg2[%c0_38, %c0_39, %c20, %c0_40] : memref<1x1x110x32xbf16, #tpu.memory_space<vmem>>, vector<1x1x80x32xbf16>
    %36 = vector.shape_cast %35 : vector<1x1x80x32xbf16> to vector<80x32xbf16>
    %c6 = arith.constant 6 : index
    %c0_41 = arith.constant 0 : index
    %c0_42 = arith.constant 0 : index
    %37 = vector.load %arg3[%c6, %c0_41, %c0_42] : memref<9x32x48xbf16, #tpu.memory_space<vmem>>, vector<1x32x48xbf16>
    %38 = vector.shape_cast %37 : vector<1x32x48xbf16> to vector<32x48xbf16>
    %cst_43 = arith.constant dense<0.000000e+00> : vector<80x48xf32>
    %39 = tpu.matmul %36, %38, %cst_43 {dimension_numbers = #tpu.dot_dimension_numbers<[1], [0], [0], [1], [0, 0, 1, 1], [], []>} : vector<80x32xbf16>, vector<32x48xbf16>, vector<80x48xf32> -> vector<80x48xf32>
    %40 = arith.addf %34, %39 : vector<80x48xf32>
    %c0_44 = arith.constant 0 : index
    %c0_45 = arith.constant 0 : index
    %c21 = arith.constant 21 : index
    %c0_46 = arith.constant 0 : index
    %41 = vector.load %arg2[%c0_44, %c0_45, %c21, %c0_46] : memref<1x1x110x32xbf16, #tpu.memory_space<vmem>>, vector<1x1x80x32xbf16>
    %42 = vector.shape_cast %41 : vector<1x1x80x32xbf16> to vector<80x32xbf16>
    %c7 = arith.constant 7 : index
    %c0_47 = arith.constant 0 : index
    %c0_48 = arith.constant 0 : index
    %43 = vector.load %arg3[%c7, %c0_47, %c0_48] : memref<9x32x48xbf16, #tpu.memory_space<vmem>>, vector<1x32x48xbf16>
    %44 = vector.shape_cast %43 : vector<1x32x48xbf16> to vector<32x48xbf16>
    %cst_49 = arith.constant dense<0.000000e+00> : vector<80x48xf32>
    %45 = tpu.matmul %42, %44, %cst_49 {dimension_numbers = #tpu.dot_dimension_numbers<[1], [0], [0], [1], [0, 0, 1, 1], [], []>} : vector<80x32xbf16>, vector<32x48xbf16>, vector<80x48xf32> -> vector<80x48xf32>
    %46 = arith.addf %40, %45 : vector<80x48xf32>
    %c0_50 = arith.constant 0 : index
    %c0_51 = arith.constant 0 : index
    %c22 = arith.constant 22 : index
    %c0_52 = arith.constant 0 : index
    %47 = vector.load %arg2[%c0_50, %c0_51, %c22, %c0_52] : memref<1x1x110x32xbf16, #tpu.memory_space<vmem>>, vector<1x1x80x32xbf16>
    %48 = vector.shape_cast %47 : vector<1x1x80x32xbf16> to vector<80x32xbf16>
    %c8 = arith.constant 8 : index
    %c0_53 = arith.constant 0 : index
    %c0_54 = arith.constant 0 : index
    %49 = vector.load %arg3[%c8, %c0_53, %c0_54] : memref<9x32x48xbf16, #tpu.memory_space<vmem>>, vector<1x32x48xbf16>
    %50 = vector.shape_cast %49 : vector<1x32x48xbf16> to vector<32x48xbf16>
    %cst_55 = arith.constant dense<0.000000e+00> : vector<80x48xf32>
    %51 = tpu.matmul %48, %50, %cst_55 {dimension_numbers = #tpu.dot_dimension_numbers<[1], [0], [0], [1], [0, 0, 1, 1], [], []>} : vector<80x32xbf16>, vector<32x48xbf16>, vector<80x48xf32> -> vector<80x48xf32>
    %52 = arith.addf %46, %51 : vector<80x48xf32>
    %c0_56 = arith.constant 0 : index
    %c0_57 = arith.constant 0 : index
    %53 = vector.load %arg4[%c0_56, %c0_57] : memref<1x48xf32, #tpu.memory_space<vmem>>, vector<1x48xf32>
    %54 = vector.broadcast %53 : vector<1x48xf32> to vector<80x48xf32>
    %55 = arith.mulf %52, %54 : vector<80x48xf32>
    %c0_58 = arith.constant 0 : index
    %c0_59 = arith.constant 0 : index
    %56 = vector.load %arg5[%c0_58, %c0_59] : memref<1x48xf32, #tpu.memory_space<vmem>>, vector<1x48xf32>
    %57 = vector.broadcast %56 : vector<1x48xf32> to vector<80x48xf32>
    %58 = arith.addf %55, %57 : vector<80x48xf32>
    %59 = vector.extract_strided_slice %58 {offsets = [0, 0], sizes = [8, 48], strides = [1, 1]} : vector<80x48xf32> to vector<8x48xf32>
    %cst_60 = arith.constant 0.000000e+00 : f32
    %60 = vector.broadcast %cst_60 : f32 to vector<8x48xf32>
    %61 = arith.maximumf %59, %60 : vector<8x48xf32>
    %62 = arith.truncf %61 : vector<8x48xf32> to vector<8x48xbf16>
    %c0_61 = arith.constant 0 : index
    %c0_62 = arith.constant 0 : index
    %c0_63 = arith.constant 0 : index
    %c0_64 = arith.constant 0 : index
    %63 = vector.load %arg6[%c0_61, %c0_62, %c0_63, %c0_64] : memref<1x8x8x48xbf16, #tpu.memory_space<vmem>>, vector<1x1x8x48xbf16>
    %64 = vector.shape_cast %63 : vector<1x1x8x48xbf16> to vector<8x48xbf16>
    %65 = vector.shape_cast %62 : vector<8x48xbf16> to vector<1x1x8x48xbf16>
    tpu.vector_store %arg6[%c0_61, %c0_62, %c0_63, %c0_64], %65 {strides = array<i32>} : memref<1x8x8x48xbf16, #tpu.memory_space<vmem>>, vector<1x1x8x48xbf16>,
    %66 = vector.extract_strided_slice %58 {offsets = [10, 0], sizes = [8, 48], strides = [1, 1]} : vector<80x48xf32> to vector<8x48xf32>
    %cst_65 = arith.constant 0.000000e+00 : f32
    %67 = vector.broadcast %cst_65 : f32 to vector<8x48xf32>
    %68 = arith.maximumf %66, %67 : vector<8x48xf32>
    %69 = arith.truncf %68 : vector<8x48xf32> to vector<8x48xbf16>
    %c0_66 = arith.constant 0 : index
    %c1_67 = arith.constant 1 : index
    %c0_68 = arith.constant 0 : index
    %c0_69 = arith.constant 0 : index
    %70 = vector.load %arg6[%c0_66, %c1_67, %c0_68, %c0_69] : memref<1x8x8x48xbf16, #tpu.memory_space<vmem>>, vector<1x1x8x48xbf16>
    %71 = vector.shape_cast %70 : vector<1x1x8x48xbf16> to vector<8x48xbf16>
    %72 = vector.shape_cast %69 : vector<8x48xbf16> to vector<1x1x8x48xbf16>
    tpu.vector_store %arg6[%c0_66, %c1_67, %c0_68, %c0_69], %72 {strides = array<i32>} : memref<1x8x8x48xbf16, #tpu.memory_space<vmem>>, vector<1x1x8x48xbf16>,
    %73 = vector.extract_strided_slice %58 {offsets = [20, 0], sizes = [8, 48], strides = [1, 1]} : vector<80x48xf32> to vector<8x48xf32>
    %cst_70 = arith.constant 0.000000e+00 : f32
    %74 = vector.broadcast %cst_70 : f32 to vector<8x48xf32>
    %75 = arith.maximumf %73, %74 : vector<8x48xf32>
    %76 = arith.truncf %75 : vector<8x48xf32> to vector<8x48xbf16>
    %c0_71 = arith.constant 0 : index
    %c2_72 = arith.constant 2 : index
    %c0_73 = arith.constant 0 : index
    %c0_74 = arith.constant 0 : index
    %77 = vector.load %arg6[%c0_71, %c2_72, %c0_73, %c0_74] : memref<1x8x8x48xbf16, #tpu.memory_space<vmem>>, vector<1x1x8x48xbf16>
    %78 = vector.shape_cast %77 : vector<1x1x8x48xbf16> to vector<8x48xbf16>
    %79 = vector.shape_cast %76 : vector<8x48xbf16> to vector<1x1x8x48xbf16>
    tpu.vector_store %arg6[%c0_71, %c2_72, %c0_73, %c0_74], %79 {strides = array<i32>} : memref<1x8x8x48xbf16, #tpu.memory_space<vmem>>, vector<1x1x8x48xbf16>,
    %80 = vector.extract_strided_slice %58 {offsets = [30, 0], sizes = [8, 48], strides = [1, 1]} : vector<80x48xf32> to vector<8x48xf32>
    %cst_75 = arith.constant 0.000000e+00 : f32
    %81 = vector.broadcast %cst_75 : f32 to vector<8x48xf32>
    %82 = arith.maximumf %80, %81 : vector<8x48xf32>
    %83 = arith.truncf %82 : vector<8x48xf32> to vector<8x48xbf16>
    %c0_76 = arith.constant 0 : index
    %c3_77 = arith.constant 3 : index
    %c0_78 = arith.constant 0 : index
    %c0_79 = arith.constant 0 : index
    %84 = vector.load %arg6[%c0_76, %c3_77, %c0_78, %c0_79] : memref<1x8x8x48xbf16, #tpu.memory_space<vmem>>, vector<1x1x8x48xbf16>
    %85 = vector.shape_cast %84 : vector<1x1x8x48xbf16> to vector<8x48xbf16>
    %86 = vector.shape_cast %83 : vector<8x48xbf16> to vector<1x1x8x48xbf16>
    tpu.vector_store %arg6[%c0_76, %c3_77, %c0_78, %c0_79], %86 {strides = array<i32>} : memref<1x8x8x48xbf16, #tpu.memory_space<vmem>>, vector<1x1x8x48xbf16>,
    %87 = vector.extract_strided_slice %58 {offsets = [40, 0], sizes = [8, 48], strides = [1, 1]} : vector<80x48xf32> to vector<8x48xf32>
    %cst_80 = arith.constant 0.000000e+00 : f32
    %88 = vector.broadcast %cst_80 : f32 to vector<8x48xf32>
    %89 = arith.maximumf %87, %88 : vector<8x48xf32>
    %90 = arith.truncf %89 : vector<8x48xf32> to vector<8x48xbf16>
    %c0_81 = arith.constant 0 : index
    %c4_82 = arith.constant 4 : index
    %c0_83 = arith.constant 0 : index
    %c0_84 = arith.constant 0 : index
    %91 = vector.load %arg6[%c0_81, %c4_82, %c0_83, %c0_84] : memref<1x8x8x48xbf16, #tpu.memory_space<vmem>>, vector<1x1x8x48xbf16>
    %92 = vector.shape_cast %91 : vector<1x1x8x48xbf16> to vector<8x48xbf16>
    %93 = vector.shape_cast %90 : vector<8x48xbf16> to vector<1x1x8x48xbf16>
    tpu.vector_store %arg6[%c0_81, %c4_82, %c0_83, %c0_84], %93 {strides = array<i32>} : memref<1x8x8x48xbf16, #tpu.memory_space<vmem>>, vector<1x1x8x48xbf16>,
    %94 = vector.extract_strided_slice %58 {offsets = [50, 0], sizes = [8, 48], strides = [1, 1]} : vector<80x48xf32> to vector<8x48xf32>
    %cst_85 = arith.constant 0.000000e+00 : f32
    %95 = vector.broadcast %cst_85 : f32 to vector<8x48xf32>
    %96 = arith.maximumf %94, %95 : vector<8x48xf32>
    %97 = arith.truncf %96 : vector<8x48xf32> to vector<8x48xbf16>
    %c0_86 = arith.constant 0 : index
    %c5_87 = arith.constant 5 : index
    %c0_88 = arith.constant 0 : index
    %c0_89 = arith.constant 0 : index
    %98 = vector.load %arg6[%c0_86, %c5_87, %c0_88, %c0_89] : memref<1x8x8x48xbf16, #tpu.memory_space<vmem>>, vector<1x1x8x48xbf16>
    %99 = vector.shape_cast %98 : vector<1x1x8x48xbf16> to vector<8x48xbf16>
    %100 = vector.shape_cast %97 : vector<8x48xbf16> to vector<1x1x8x48xbf16>
    tpu.vector_store %arg6[%c0_86, %c5_87, %c0_88, %c0_89], %100 {strides = array<i32>} : memref<1x8x8x48xbf16, #tpu.memory_space<vmem>>, vector<1x1x8x48xbf16>,
    %101 = vector.extract_strided_slice %58 {offsets = [60, 0], sizes = [8, 48], strides = [1, 1]} : vector<80x48xf32> to vector<8x48xf32>
    %cst_90 = arith.constant 0.000000e+00 : f32
    %102 = vector.broadcast %cst_90 : f32 to vector<8x48xf32>
    %103 = arith.maximumf %101, %102 : vector<8x48xf32>
    %104 = arith.truncf %103 : vector<8x48xf32> to vector<8x48xbf16>
    %c0_91 = arith.constant 0 : index
    %c6_92 = arith.constant 6 : index
    %c0_93 = arith.constant 0 : index
    %c0_94 = arith.constant 0 : index
    %105 = vector.load %arg6[%c0_91, %c6_92, %c0_93, %c0_94] : memref<1x8x8x48xbf16, #tpu.memory_space<vmem>>, vector<1x1x8x48xbf16>
    %106 = vector.shape_cast %105 : vector<1x1x8x48xbf16> to vector<8x48xbf16>
    %107 = vector.shape_cast %104 : vector<8x48xbf16> to vector<1x1x8x48xbf16>
    tpu.vector_store %arg6[%c0_91, %c6_92, %c0_93, %c0_94], %107 {strides = array<i32>} : memref<1x8x8x48xbf16, #tpu.memory_space<vmem>>, vector<1x1x8x48xbf16>,
    %108 = vector.extract_strided_slice %58 {offsets = [70, 0], sizes = [8, 48], strides = [1, 1]} : vector<80x48xf32> to vector<8x48xf32>
    %cst_95 = arith.constant 0.000000e+00 : f32
    %109 = vector.broadcast %cst_95 : f32 to vector<8x48xf32>
    %110 = arith.maximumf %108, %109 : vector<8x48xf32>
    %111 = arith.truncf %110 : vector<8x48xf32> to vector<8x48xbf16>
    %c0_96 = arith.constant 0 : index
    %c7_97 = arith.constant 7 : index
    %c0_98 = arith.constant 0 : index
    %c0_99 = arith.constant 0 : index
    %112 = vector.load %arg6[%c0_96, %c7_97, %c0_98, %c0_99] : memref<1x8x8x48xbf16, #tpu.memory_space<vmem>>, vector<1x1x8x48xbf16>
    %113 = vector.shape_cast %112 : vector<1x1x8x48xbf16> to vector<8x48xbf16>
    %114 = vector.shape_cast %111 : vector<8x48xbf16> to vector<1x1x8x48xbf16>
    tpu.vector_store %arg6[%c0_96, %c7_97, %c0_98, %c0_99], %114 {strides = array<i32>} : memref<1x8x8x48xbf16, #tpu.memory_space<vmem>>, vector<1x1x8x48xbf16>,
    return
  }
  func.func @transform_0(%arg0: i32, %arg1: i32) -> (i32, i32, i32, i32) {
    %c0_i32 = arith.constant 0 : i32
    %c0_i32_0 = arith.constant 0 : i32
    %c0_i32_1 = arith.constant 0 : i32
    return %arg0, %arg1, %c0_i32, %c0_i32_0 : i32, i32, i32, i32
  }
  func.func @transform_1(%arg0: i32, %arg1: i32) -> (i32, i32, i32) {
    %c0_i32 = arith.constant 0 : i32
    %c0_i32_0 = arith.constant 0 : i32
    %c0_i32_1 = arith.constant 0 : i32
    %c0_i32_2 = arith.constant 0 : i32
    return %c0_i32, %c0_i32_0, %c0_i32_1 : i32, i32, i32
  }
  func.func @transform_2(%arg0: i32, %arg1: i32) -> (i32, i32) {
    %c0_i32 = arith.constant 0 : i32
    %c0_i32_0 = arith.constant 0 : i32
    %c0_i32_1 = arith.constant 0 : i32
    return %c0_i32, %c0_i32_0 : i32, i32
  }
  func.func @transform_3(%arg0: i32, %arg1: i32) -> (i32, i32) {
    %c0_i32 = arith.constant 0 : i32
    %c0_i32_0 = arith.constant 0 : i32
    %c0_i32_1 = arith.constant 0 : i32
    return %c0_i32, %c0_i32_0 : i32, i32
  }
  func.func @transform_4(%arg0: i32, %arg1: i32) -> (i32, i32, i32, i32) {
    %c0_i32 = arith.constant 0 : i32
    %c0_i32_0 = arith.constant 0 : i32
    %c0_i32_1 = arith.constant 0 : i32
    return %arg0, %arg1, %c0_i32, %c0_i32_0 : i32, i32, i32, i32
  }
}

</mosaic_0001>

<bundles_post_ra>
// kernel: tpu_custom_call.1
= control target key start
LH: loop header
LB: loop body
LE: loop exit
PB: predicated region body
PF: predicated region fallthrough
CT: control target
= control target key end

     0   :  { %9 = vsyncpa [#allocation3], 0  ;;  %s1838_s0 = inlined_call_operand.vmem [shape: bf16[1,1,110,32], index: 0, kind: input, shape index: {}]   ;;  %s1839_s1 = inlined_call_operand.hbm [shape: bf16[9,32,48], index: 1, kind: input, shape index: {}]   ;;  %s1840_s2 = inlined_call_operand.vmem [shape: f32[1,48], index: 2, kind: input, shape index: {}]   ;;  %s1841_s3 = inlined_call_operand.vmem [shape: f32[1,48], index: 3, kind: input, shape index: {}]   ;;  %s1842_s4 = inlined_call_operand.hbm [shape: bf16[1,8,8,48], index: 4, kind: output, shape index: {}]  }
   0x1   :  { %10 = vsyncpa [#allocation4], 0  ;;  %s17_s17 = sshll.u32 %s1839_s1, 4  ;;  %s1444_s18 = smov [#allocation2]   ;;  %s18_s17 = int_to_ptr.hbm [resolvable:$true] %s17_s17 }
   0x2   :  { %s19_s19 = sshll.u32 %s1444_s18, 4  ;;  %s1445_s20 = smov 64   ;;  %s20_s19 = int_to_ptr.vmem [resolvable:$true] %s19_s19 }
   0x3   :  { %s1446_s21 = smov 4  }
   0x4   :  { %25 = dma.hbm_to_vmem [thread:$0]  %s18_s17, 2304, %s20_s19, [#allocation3], %s1445_s20, %s1445_s20, %s1446_s21  }
   0x5   :  { %1440 = dma.done.wait [#allocation3], 2304  }
   0x6   :  { %1441 = vsyncadd [#allocation3], 4294964992  ;;  %v1350_v0 = vld [vmem:[#allocation2 + $0x18] sm:$0xff]  ;;  %v1482_v1 = vld [vmem:[%s1838_s0 + $0x8] sm:$0xff]  ;;  %vm83_vm0 = vsmask.f32 7424 }
   0x7   :  { %v1487_v2 = vld [vmem:[%s1838_s0 + $0x10] sm:$0xff]  ;;  %v1492_v3 = vld [vmem:[%s1838_s0 + $0x18] sm:$0xff]  ;;  %1380 = vmatpush.bf16.msra.mxu1 %v1350_v0  ;;  %1381 = vmatpush.bf16.msra.mxu2 %v1350_v0  ;;  %v92_v5 = vshll.u32 %v1482_v1, 16  ;;  %v96_v6 = vshrl.u32 %v1482_v1, 16  ;;  %v1499_v7 = vld [vmem:[%s1838_s0 + $0x20] sm:$0xff]  ;;  %vm140_vm1 = vcmask 261120  }
   0x8   :  { %v1349_v4 = vld [vmem:[#allocation2 + $0x10] sm:$0xff]  ;;  %v49_v8 = vld [vmem:[%s1838_s0 + $0x28] sm:$0x1]  ;;  %v100_v9 = vshll.u32 %v1487_v2, 16  ;;  %v104_v10 = vshrl.u32 %v1487_v2, 16  ;;  %v108_v11 = vshll.u32 %v1492_v3, 16  ;;  %1382 = vmatpush.bf16.msra.mxu3 %v1350_v0  ;;  %162 = vmatpush.bf16.msra.mxu0 %v1350_v0 }
   0x9   :  { %v1352_v12 = vld [vmem:[#allocation2 + $0x28] sm:$0xff]  ;;  %v76_v13 = vunpack.c.l.b16 %v49_v8  ;;  %v1510_v14 = vld [vmem:[%s1838_s0] sm:$0xff]   ;;  %v94_v15 = vrot.slane %v92_v5, 1  ;;  %v116_v17 = vshll.u32 %v1499_v7, 16  ;;  %v120_v18 = vshrl.u32 %v1499_v7, 16  ;;  %v1358_v22 = vld [vmem:[#allocation2 + $0x38] sm:$0xff] }
   0xa   :  { %v1348_v16 = vld [vmem:[#allocation2 + $0x8] sm:$0xff]  ;;  %v102_v19 = vrot.slane %v100_v9, 1  ;;  %v110_v20 = vrot.slane %v108_v11, 1  ;;  %v338_v23 = vld [vmem:[%s1838_s0 + $0x4] sm:$0xe]  ;;  %v85_v27 = vshrl.u32 %v1510_v14, 16 }
   0xb   :  { %v1514_v21 = vpack.c.b16 %v76_v13, %v76_v13  ;;  %v1522_v24 = vld [vmem:[%s1838_s0 + $0x8] sm:$0xff]   ;;  %1383 = vmatpush.bf16.msra.mxu1 %v1349_v4  ;;  %1384 = vmatpush.bf16.msra.mxu2 %v1349_v4  ;;  %v98_v25 = vor.u32 %v96_v6, %v94_v15  ;;  %v118_v26 = vrot.slane %v116_v17, 1  ;;  %v87_v28 = vshll.u32 %v1510_v14, 16  ;;  %v1351_v32 = vld [vmem:[#allocation2 + $0x20] sm:$0xff]  ;;  %v1357_v41 = vld [vmem:[#allocation2 + $0x30] sm:$0xff]  ;;  %s1159_s26 = sshll.u32 %s1842_s4, 4  ;;  %s1160_s26 = int_to_ptr.hbm [resolvable:$true] %s1159_s26 }
   0xc   :  { %v1360_v29 = vld [vmem:[#allocation2 + $0x48] sm:$0xff]  ;;  %v106_v30 = vor.u32 %v104_v10, %v102_v19  ;;  %1385 = vmatpush.bf16.msra.mxu3 %v1349_v4  ;;  %v365_v33 = vunpack.c.l.b16 %v338_v23  ;;  %v1347_v36 = vld [vmem:[#allocation2] sm:$0xff]  ;;  %163 = vmatpush.bf16.msra.mxu0 %v1349_v4  ;;  %v366_v38 = vunpack.c.l.b16 %v1522_v24  ;;  %v1370_v46 = vld [vmem:[#allocation2 + $0x78] sm:$0xff]  ;;  %v112_v56 = vshrl.u32 %v1492_v3, 16 }
   0xd   :  { %v124_v31 = vshll.u32 %v1514_v21, 16  ;;  %v103_v34 = vsel %vm83_vm0, %v98_v25, %v102_v19  ;;  %v122_v35 = vor.u32 %v120_v18, %v118_v26  ;;  %v89_v37 = vrot.slane %v87_v28, 1  ;;  %v1359_v43 = vld [vmem:[#allocation2 + $0x40] sm:$0xff]  ;;  %v1368_v44 = vld [vmem:[#allocation2 + $0x68] sm:$0xff]  ;;  %v1362_v47 = vld [vmem:[#allocation2 + $0x58] sm:$0xff] }
   0xe   :  { %1197 = vmatmul.msk.bf16.vlgmr.msra.gmra.mxu1 %vm140_vm1, %v103_v34  ;;  %v111_v39 = vsel %vm83_vm0, %v106_v30, %v110_v20  ;;  %v1538_v49 = vld [vmem:[%s1838_s0 + $0xc] sm:$0xff]  ;;  %v376_v50 = vpack.c.b16 %v366_v38, %v365_v33  ;;  %v114_v61 = vor.u32 %v112_v56, %v110_v20  ;;  %vm255_vm2 = vcmask 1046528   ;;  %v1377_v9 = vld [vmem:[%s1838_s0] sm:$0xf0]  ;;  %v1378_v10 = vld [vmem:[%s1838_s0] sm:$0xe] }
   0xf   :  { %300 = vmatpush.bf16.msrb.mxu2 %v1352_v12  ;;  %218 = vmatpush.bf16.msrb.mxu1 %v1348_v16  ;;  %v126_v40 = vrot.slane %v124_v31, 1  ;;  %v90_v42 = vor.u32 %v89_v37, %v85_v27  ;;  %v1372_v51 = vld [vmem:[#allocation2 + $0x88] sm:$0xff]  ;;  %v483_v54 = vshrl.u32 %v1538_v49, 16  ;;  %v486_v55 = vshll.u32 %v1538_v49, 16  ;;  %v1563_v11 = vld [vmem:[%s1838_s0 + $0x14] sm:$0xff]  ;;  %v1580_v27 = vld [vmem:[%s1838_s0 + $0x1c] sm:$0xff] }
  0x10   :  { %426 = vmatpush.bf16.msrb.mxu3 %v1358_v22  ;;  %1198 = vmatmul.msk.bf16.vlgmr.msra.gmra.mxu2 %vm140_vm1, %v111_v39  ;;  %v475_v52 = vshrl.u32 %v376_v50, 16  ;;  %v478_v53 = vshll.u32 %v376_v50, 16  ;;  %v382_v62 = vrot.slane %v376_v50, 1  ;;  %v383_v63 = vrot.slane %v1538_v49, 1  ;;  %v1369_v28 = vld [vmem:[#allocation2 + $0x70] sm:$0xff] }
  0x11   :  { %560 = vmatpush.bf16.msrb.mxu0 %v1360_v29  ;;  %v127_v45 = vsel %vm83_vm0, %v122_v35, %v126_v40  ;;  %v95_v48 = vsel %vm83_vm0, %v90_v42, %v94_v15  ;;  %v485_v59 = vrot.slane %v483_v54, 1  ;;  %v488_v60 = vrot.slane %v486_v55, 2  ;;  %v1361_v29 = vld [vmem:[#allocation2 + $0x50] sm:$0xff]  ;;  %v1371_v40 = vld [vmem:[#allocation2 + $0x80] sm:$0xff] }
  0x12   :  { %1200 = vmatmul.msk.bf16.vlgmr.msra.gmra.mxu3 %vm140_vm1, %v127_v45  ;;  %1196 = vmatmul.msk.bf16.vlgmr.msra.gmra.mxu0 %vm140_vm1, %v95_v48  ;;  %v477_v57 = vrot.slane %v475_v52, 1  ;;  %v480_v58 = vrot.slane %v478_v53, 2  ;;  %v119_v5 = vsel %vm83_vm0, %v114_v61, %v118_v26  ;;  %vm473_vm3 = vsmask.f32 6400  ;;  %v1367_v26 = vld [vmem:[#allocation2 + $0x60] sm:$0xff] }
  0x13   :  { %301 = vmatpush.bf16.msrb.mxu2 %v1351_v32  ;;  %219 = vmatpush.bf16.msrb.mxu1 %v1347_v36  ;;  %v489_v4 = vor.u32 %v488_v60, %v485_v59  ;;  %v384_v6 = vsel %vm255_vm2, %v382_v62, %v383_v63  ;;  %v492_v12 = vshrl.u32 %v1563_v11, 16  ;;  %v495_v13 = vshll.u32 %v1563_v11, 16  ;;  %v598_v48 = vld [vmem:[%s1838_s0 + $0x4] sm:$0xc] }
  0x14   :  { %427 = vmatpush.bf16.msrb.mxu3 %v1357_v41  ;;  %v481_v0 = vor.u32 %v480_v58, %v477_v57  ;;  %v257_v18 = vrot.slane %v1482_v1, 1  ;;  %v385_v19 = vrot.slane %v1563_v11, 1  ;;  %v504_v30 = vshll.u32 %v1580_v27, 16  ;;  %v1597_v41 = vld [vmem:[%s1838_s0 + $0x24] sm:$0xff] }
  0x15   :  { %561 = vmatpush.bf16.msrb.mxu0 %v1359_v43  ;;  %v494_v15 = vrot.slane %v492_v12, 1  ;;  %v497_v16 = vrot.slane %v495_v13, 2  ;;  %v259_v33 = vrot.slane %v1487_v2, 1  ;;  %v387_v34 = vrot.slane %v1580_v27, 1 }
  0x16   :  { %v490_v8 = vsel %vm473_vm3, %v481_v0, %v489_v4  ;;  %v386_v23 = vsel %vm255_vm2, %v383_v63, %v385_v19  ;;  %v506_v32 = vrot.slane %v504_v30, 2  ;;  %v263_v42 = vrot.slane %v1499_v7, 1 }
  0x17   :  { %778 = vmatpush.bf16.msra.mxu2 %v1368_v44  ;;  %652 = vmatpush.bf16.msra.mxu1 %v1362_v47  ;;  %v498_v20 = vor.u32 %v497_v16, %v494_v15  ;;  %v260_v36 = vsel %vm255_vm2, %v257_v18, %v259_v33  ;;  %v388_v37 = vsel %vm255_vm2, %v385_v19, %v387_v34  ;;  %v265_v43 = vrot.slane %v1514_v21, 1  ;;  %v464_v21 = vld [vmem:[%s1838_s0 + $0x2c] sm:$0x3] }
  0x18   :  { %912 = vmatpush.bf16.msra.mxu3 %v1370_v46  ;;  %v513_v44 = vshll.u32 %v1597_v41, 16  ;;  %v261_v50 = vrot.slane %v1492_v3, 1  ;;  %v389_v52 = vrot.slane %v1597_v41, 1  ;;  %v471_v55 = vunpack.c.l.b16 %v464_v21 }
  0x19   :  { %1004 = vmatpush.bf16.msra.mxu0 %v1372_v51  ;;  %v499_v25 = vsel %vm473_vm3, %v489_v4, %v498_v20  ;;  %v1605_v45 = vsel %vm255_vm2, %v263_v42, %v265_v43  ;;  %v605_v51 = vunpack.c.l.b16 %v598_v48  ;;  %v609_v58 = vrot.slane %v1538_v49, 2 }
  0x1a   :  { %v515_v47 = vrot.slane %v513_v44, 2  ;;  %v262_v56 = vsel %vm255_vm2, %v259_v33, %v261_v50  ;;  %vm607_vm4 = vcmask 1045504   ;;  %v390_v59 = vsel %vm255_vm2, %v387_v34, %v389_v52 }
  0x1b   :  { %779 = vmatpush.bf16.msra.mxu2 %v1367_v26  ;;  %653 = vmatpush.bf16.msra.mxu1 %v1361_v29  ;;  %v606_v53 = vpack.c.b16 %v366_v38, %v605_v51  ;;  %v348_v38 = vld [vmem:[%s1838_s0 + $0x2c] sm:$0x1]  ;;  %v1628_v62 = vpack.c.b16 %v471_v55, %v471_v55  ;;  %v611_v49 = vrot.slane %v1563_v11, 2  ;;  %v718_v13 = vunpack.c.h.b16 %v1522_v24  ;;  %v950_v24 = vld [vmem:[%s1838_s0 + $0x8] sm:$0x8] }
  0x1c   :  { %913 = vmatpush.bf16.msra.mxu3 %v1369_v28  ;;  %v264_v15 = vsel %vm255_vm2, %v261_v50, %v263_v42  ;;  %vm825_vm5 = vsmask.f32 5376  ;;  %vm959_vm6 = vcmask 1044480   ;;  %v1672_v50 = vld [vmem:[%s1838_s0 + $0x20] sm:$0xff]  ;;  %v613_v55 = vrot.slane %v1580_v27, 2 }
  0x1d   :  { %1005 = vmatpush.bf16.msra.mxu0 %v1371_v40  ;;  %v608_v57 = vrot.slane %v606_v53, 2  ;;  %v519_v63 = vshrl.u32 %v1628_v62, 16  ;;  %v522_v0 = vshll.u32 %v1628_v62, 16  ;;  %v612_v4 = vsel %vm607_vm4, %v609_v58, %v611_v49 }
  0x1e   :  { %1209 = vmatmul.msk.bf16.vlgmr.msrb.gmra.mxu1 %vm140_vm1, %v1510_v14  ;;  %v1379_v14 = vor.u32 %v1378_v10, %v1377_v9  ;;  %v690_v9 = vld [vmem:[%s1838_s0 + $0x8] sm:$0xc]  ;;  %v853_v21 = vshrl.u32 %v1672_v50, 16  ;;  %vm1072_vm7 = vcmask 388096   ;;  %vm1080_vm8 = vcmask 1042432  }
  0x1f   :  { %v610_v60 = vsel %vm607_vm4, %v608_v57, %v609_v58  ;;  %v717_v12 = vunpack.c.l.b16 %v690_v9  ;;  %v615_v9 = vrot.slane %v1597_v41, 2  ;;  %vm1081_vm9 = vcmask 1046532  }
  0x20   :  { %1199 = vmatmul.msk.bf16.gmra.mxu2 %vm140_vm1, %v119_v5  ;;  %v256_v17 = vrot.slane %v1379_v14, 1  ;;  %v855_v53 = vrot.slane %v853_v21, 2  ;;  %vm1781_vm10 = vmor %vm1080_vm8, %vm1081_vm9  ;;  %vm1093_vm11 = vcmask 1041408   ;;  %vm1094_vm12 = vcmask 1045508  }
  0x21   :  { %vm1791_vm13 = vmor %vm1093_vm11, %vm1094_vm12  ;;  %vm1106_vm14 = vcmask 1040384   ;;  %vm1107_vm15 = vcmask 1044484  }
  0x22   :  { %1251 = vmatmul.msk.bf16.vlgmr.msrb.gmra.mxu3 %vm140_vm1, %v384_v6  ;;  %1264 = vmatmul.msk.bf16.vlgmr.msrb.gmra.mxu0 %vm140_vm1, %v490_v8  ;;  %v258_v22 = vsel %vm255_vm2, %v256_v17, %v257_v18  ;;  %v521_v6 = vrot.slane %v519_v63, 1  ;;  %v524_v8 = vrot.slane %v522_v0, 2  ;;  %v1363_v17 = vld [vmem:[%s1838_s0 + $0x10] sm:$0xff]  ;;  %v728_v18 = vpack.c.b16 %v718_v13, %v717_v12  ;;  %vm1801_vm0 = vmor %vm1106_vm14, %vm1107_vm15 }
  0x23   :  { %v961_v34 = vrot.slane %v1363_v17, 3  ;;  %v735_v44 = vrot.slane %v1363_v17, 2  ;;  %v816_v12 = vld [vmem:[%s1838_s0 + $0x30] sm:$0x7] }
  0x24   :  { %v525_v14 = vor.u32 %v524_v8, %v521_v6 }
  0x2e   :  { %1210 = vmatmul.msk.bf16.gmra.mxu1 %vm140_vm1, %v1482_v1  ;;  %v501_v1 = vshrl.u32 %v1580_v27, 16 }
  0x30   :  { %1222 = vmatmul.msk.bf16.vlgmr.msrb.gmra.mxu2 %vm140_vm1, %v258_v22  ;;  %v503_v31 = vrot.slane %v501_v1, 1  ;;  %v835_v22 = vshrl.u32 %v1363_v17, 16 }
  0x32   :  { %1252 = vmatmul.msk.bf16.gmra.mxu3 %vm140_vm1, %v386_v23  ;;  %1265 = vmatmul.msk.bf16.gmra.mxu0 %vm140_vm1, %v499_v25  ;;  %v507_v35 = vor.u32 %v506_v32, %v503_v31  ;;  %v838_v23 = vshll.u32 %v1363_v17, 16  ;;  %v957_v25 = vunpack.c.l.b16 %v950_v24  ;;  %v837_v29 = vrot.slane %v835_v22, 2 }
  0x34   :  { %v508_v39 = vsel %vm473_vm3, %v498_v20, %v507_v35  ;;  %v830_v20 = vshll.u32 %v728_v18, 16  ;;  %v840_v1 = vrot.slane %v838_v23, 3  ;;  %v958_v30 = vpack.c.b16 %v718_v13, %v957_v25 }
  0x35   :  { %v739_v13 = vrot.slane %v1672_v50, 2 }
  0x36   :  { %v832_v28 = vrot.slane %v830_v20, 3  ;;  %v841_v32 = vor.u32 %v840_v1, %v837_v29  ;;  %v960_v33 = vrot.slane %v958_v30, 3 }
  0x3e   :  { %1211 = vmatmul.msk.bf16.gmra.mxu1 %vm140_vm1, %v1487_v2  ;;  %v510_v2 = vshrl.u32 %v1597_v41, 16 }
  0x40   :  { %1223 = vmatmul.msk.bf16.gmra.mxu2 %vm140_vm1, %v260_v36  ;;  %v512_v46 = vrot.slane %v510_v2, 1  ;;  %v1364_v36 = vld [vmem:[%s1838_s0 + $0x18] sm:$0xff]  ;;  %v734_v2 = vrot.slane %v728_v18, 2 }
  0x41   :  { %v847_v40 = vshll.u32 %v1364_v36, 16 }
  0x42   :  { %1253 = vmatmul.msk.bf16.gmra.mxu3 %vm140_vm1, %v388_v37  ;;  %1266 = vmatmul.msk.bf16.gmra.mxu0 %vm140_vm1, %v508_v39  ;;  %v516_v54 = vor.u32 %v515_v47, %v512_v46  ;;  %v962_v37 = vsel %vm959_vm6, %v960_v33, %v961_v34  ;;  %v844_v39 = vshrl.u32 %v1364_v36, 16  ;;  %v963_v47 = vrot.slane %v1364_v36, 3 }
  0x43   :  { %v849_v43 = vrot.slane %v847_v40, 3  ;;  %v736_v48 = vsel %vm607_vm4, %v734_v2, %v735_v44 }
  0x44   :  { %v517_v61 = vsel %vm473_vm3, %v507_v35, %v516_v54  ;;  %v526_v19 = vsel %vm473_vm3, %v516_v54, %v525_v14  ;;  %v846_v42 = vrot.slane %v844_v39, 2  ;;  %v964_v51 = vsel %vm959_vm6, %v961_v34, %v963_v47 }
  0x45   :  { %v617_v34 = vrot.slane %v1628_v62, 2 }
  0x46   :  { %v850_v46 = vor.u32 %v849_v43, %v846_v42 }
  0x47   :  { %v618_v42 = vsel %vm607_vm4, %v615_v9, %v617_v34 }
  0x4e   :  { %1212 = vmatmul.msk.bf16.gmra.mxu1 %vm140_vm1, %v1492_v3  ;;  %v375_v3 = vunpack.c.l.b16 %v348_v38 }
  0x50   :  { %1224 = vmatmul.msk.bf16.gmra.mxu2 %vm140_vm1, %v262_v56  ;;  %v381_v5 = vpack.c.b16 %v375_v3, %v375_v3  ;;  %v737_v56 = vrot.slane %v1364_v36, 2  ;;  %v1691_v3 = vld [vmem:[%s1838_s0 + $0x28] sm:$0xff] }
  0x51   :  { %v862_v63 = vshrl.u32 %v1691_v3, 16  ;;  %v865_v0 = vshll.u32 %v1691_v3, 16  ;;  %v741_v36 = vrot.slane %v1691_v3, 2 }
  0x52   :  { %1254 = vmatmul.msk.bf16.gmra.mxu3 %vm140_vm1, %v390_v59  ;;  %1267 = vmatmul.msk.bf16.gmra.mxu0 %vm140_vm1, %v517_v61  ;;  %v391_v10 = vrot.slane %v381_v5, 1  ;;  %v614_v59 = vsel %vm607_vm4, %v611_v49, %v613_v55  ;;  %v738_v61 = vsel %vm607_vm4, %v735_v44, %v737_v56 }
  0x53   :  { %v864_v6 = vrot.slane %v862_v63, 2  ;;  %v867_v8 = vrot.slane %v865_v0, 3  ;;  %v742_v44 = vsel %vm607_vm4, %v739_v13, %v741_v36 }
  0x54   :  { %v392_v16 = vsel %vm255_vm2, %v389_v52, %v391_v10  ;;  %v856_v52 = vshll.u32 %v1672_v50, 16 }
  0x56   :  { %v858_v54 = vrot.slane %v856_v52, 3 }
  0x58   :  { %v859_v57 = vor.u32 %v858_v54, %v855_v53 }
  0x5a   :  { %v860_v38 = vsel %vm825_vm5, %v850_v46, %v859_v57 }
  0x5e   :  { %1213 = vmatmul.msk.bf16.gmra.mxu1 %vm140_vm1, %v1499_v7  ;;  %v827_v7 = vshrl.u32 %v728_v18, 16  ;;  %v616_v18 = vsel %vm607_vm4, %v613_v55, %v615_v9 }
  0x60   :  { %1225 = vmatmul.msk.bf16.gmra.mxu2 %vm140_vm1, %v264_v15  ;;  %v829_v26 = vrot.slane %v827_v7, 2  ;;  %v868_v15 = vor.u32 %v867_v8, %v864_v6  ;;  %v740_v7 = vsel %vm607_vm4, %v737_v56, %v739_v13 }
  0x62   :  { %1255 = vmatmul.msk.bf16.gmra.mxu3 %vm140_vm1, %v392_v16  ;;  %1268 = vmatmul.msk.bf16.gmra.mxu0 %vm140_vm1, %v526_v19  ;;  %v833_v31 = vor.u32 %v832_v28, %v829_v26  ;;  %v823_v16 = vunpack.c.l.b16 %v816_v12  ;;  %v967_v19 = vrot.slane %v1691_v3, 3  ;;  %v869_v20 = vsel %vm825_vm5, %v859_v57, %v868_v15 }
  0x64   :  { %v842_v35 = vsel %vm825_vm5, %v833_v31, %v841_v32  ;;  %v824_v22 = vpack.c.b16 %v823_v16, %v823_v16 }
  0x66   :  { %v871_v28 = vshrl.u32 %v824_v22, 16  ;;  %v874_v29 = vshll.u32 %v824_v22, 16  ;;  %v969_v43 = vrot.slane %v824_v22, 3 }
  0x68   :  { %v876_v33 = vrot.slane %v874_v29, 3 }
  0x6e   :  { %1277 = vmatmul.msk.bf16.vlgmr.msra.gmra.mxu1 %vm140_vm1, %v610_v60  ;;  %v965_v60 = vrot.slane %v1672_v50, 3 }
  0x70   :  { %1226 = vmatmul.msk.bf16.gmra.mxu2 %vm140_vm1, %v1605_v45  ;;  %v851_v45 = vsel %vm825_vm5, %v841_v32, %v850_v46  ;;  %v966_v11 = vsel %vm959_vm6, %v963_v47, %v965_v60  ;;  %v968_v25 = vsel %vm959_vm6, %v965_v60, %v967_v19  ;;  %v873_v32 = vrot.slane %v871_v28, 2  ;;  %v700_v47 = vld [vmem:[%s1838_s0 + $0x30] sm:$0x3] }
  0x71   :  { %v727_v50 = vunpack.c.l.b16 %v700_v47 }
  0x72   :  { %1319 = vmatmul.msk.bf16.vlgmr.msra.gmra.mxu3 %vm140_vm1, %v842_v35  ;;  %1332 = vmatmul.msk.bf16.vlgmr.msra.gmra.mxu0 %vm140_vm1, %v962_v37  ;;  %v877_v39 = vor.u32 %v876_v33, %v873_v32 }
  0x73   :  { %v733_v55 = vpack.c.b16 %v727_v50, %v727_v50 }
  0x74   :  { %v878_v62 = vsel %vm825_vm5, %v868_v15, %v877_v39 }
  0x7e   :  { %1278 = vmatmul.msk.bf16.gmra.mxu1 %vm140_vm1, %v612_v4 }
  0x80   :  { %1306 = vmatmul.msk.bf16.vlgmr.msra.gmra.mxu2 %vm140_vm1, %v736_v48 }
  0x82   :  { %1320 = vmatmul.msk.bf16.gmra.mxu3 %vm140_vm1, %v851_v45  ;;  %1333 = vmatmul.msk.bf16.gmra.mxu0 %vm140_vm1, %v964_v51  ;;  %v970_v45 = vsel %vm959_vm6, %v967_v19, %v969_v43 }
  0x8b   :  { %v170_v58 = vpop.f32.mrf.mxu1 }
  0x8e   :  { %1279 = vmatmul.msk.bf16.gmra.mxu1 %vm140_vm1, %v614_v59  ;;  %v743_v59 = vrot.slane %v733_v55, 2 }
  0x8f   :  { %v165_v27 = vpop.f32.mrf.mxu0 }
  0x90   :  { %1307 = vmatmul.msk.bf16.gmra.mxu2 %vm140_vm1, %v738_v61 }
  0x92   :  { %1321 = vmatmul.msk.bf16.gmra.mxu3 %vm140_vm1, %v860_v38  ;;  %1334 = vmatmul.msk.bf16.gmra.mxu0 %vm140_vm1, %v966_v11 }
  0x93   :  { %v1696_v49 = vpop.f32.mrf.mxu2  ;;  %v172_v4 = vpop.f32.mrf.mxu1 }
  0x95   :  { %v1701_v5 = vpop.f32.mrf.mxu3 }
  0x97   :  { %v167_v10 = vpop.f32.mrf.mxu0 }
  0x9b   :  { %v1708_v14 = vpop.f32.mrf.mxu2  ;;  %v221_v17 = vpop.f32.mrf.mxu1 }
  0x9c   :  { %v222_v24 = vadd.f32 %v221_v17, %v165_v27  ;;  %v744_v27 = vsel %vm607_vm4, %v741_v36, %v743_v59 }
  0x9d   :  { %v1713_v41 = vpop.f32.mrf.mxu3 }
  0x9e   :  { %1280 = vmatmul.msk.bf16.gmra.mxu1 %vm140_vm1, %v616_v18 }
  0x9f   :  { %v563_v23 = vpop.f32.mrf.mxu0 }
  0xa0   :  { %1308 = vmatmul.msk.bf16.gmra.mxu2 %vm140_vm1, %v740_v7 }
  0xa2   :  { %1322 = vmatmul.msk.bf16.gmra.mxu3 %vm140_vm1, %v869_v20  ;;  %1335 = vmatmul.msk.bf16.gmra.mxu0 %vm140_vm1, %v968_v25 }
  0xa3   :  { %v180_v26 = vpop.f32.mrf.mxu2  ;;  %v223_v1 = vpop.f32.mrf.mxu1 }
  0xa4   :  { %v224_v30 = vadd.f32 %v223_v1, %v167_v10 }
  0xa5   :  { %v429_v31 = vpop.f32.mrf.mxu3 }
  0xa7   :  { %v565_v35 = vpop.f32.mrf.mxu0 }
  0xab   :  { %v182_v37 = vpop.f32.mrf.mxu2  ;;  %v226_v40 = vpop.f32.mrf.mxu1 }
  0xac   :  { %v227_v2 = vadd.f32 %v226_v40, %v170_v58 }
  0xad   :  { %v431_v46 = vpop.f32.mrf.mxu3 }
  0xae   :  { %1281 = vmatmul.msk.bf16.gmra.mxu1 %vm140_vm1, %v618_v42 }
  0xaf   :  { %v568_v48 = vpop.f32.mrf.mxu0 }
  0xb0   :  { %1309 = vmatmul.msk.bf16.gmra.mxu2 %vm140_vm1, %v742_v44 }
  0xb2   :  { %1323 = vmatmul.msk.bf16.gmra.mxu3 %vm140_vm1, %v878_v62  ;;  %1336 = vmatmul.msk.bf16.gmra.mxu0 %vm140_vm1, %v970_v45 }
  0xb3   :  { %v303_v51 = vpop.f32.mrf.mxu2  ;;  %v228_v52 = vpop.f32.mrf.mxu1 }
  0xb4   :  { %v328_v21 = vadd.f32 %v303_v51, %v222_v24  ;;  %v229_v53 = vadd.f32 %v228_v52, %v172_v4 }
  0xb5   :  { %v434_v54 = vpop.f32.mrf.mxu3 }
  0xb6   :  { %v454_v56 = vadd.f32 %v429_v31, %v328_v21 }
  0xb7   :  { %v570_v57 = vpop.f32.mrf.mxu0 }
  0xb8   :  { %v1734_v58 = vadd.f32 %v563_v23, %v454_v56 }
  0xbb   :  { %v305_v60 = vpop.f32.mrf.mxu2  ;;  %v231_v38 = vpop.f32.mrf.mxu1 }
  0xbc   :  { %v329_v61 = vadd.f32 %v305_v60, %v224_v30  ;;  %v232_v3 = vadd.f32 %v231_v38, %v1696_v49 }
  0xbd   :  { %v436_v11 = vpop.f32.mrf.mxu3 }
  0xbe   :  { %v455_v63 = vadd.f32 %v431_v46, %v329_v61 }
  0xbf   :  { %v573_v0 = vpop.f32.mrf.mxu0 }
  0xc0   :  { %1310 = vmatmul.msk.bf16.gmra.mxu2 %vm140_vm1, %v744_v27  ;;  %v1739_v4 = vadd.f32 %v565_v35, %v455_v63 }
  0xc3   :  { %v308_v6 = vpop.f32.mrf.mxu2  ;;  %v233_v9 = vpop.f32.mrf.mxu1 }
  0xc4   :  { %v330_v8 = vadd.f32 %v308_v6, %v227_v2  ;;  %v234_v10 = vadd.f32 %v233_v9, %v1708_v14  ;;  %v1764_v9 = vld [vmem:[%s1840_s2] ss:$0 sm:$0xff]  ;;  %s1447_s2 = smov [#allocation5]  }
  0xc5   :  { %v439_v12 = vpop.f32.mrf.mxu3 }
  0xc6   :  { %v456_v13 = vadd.f32 %v434_v54, %v330_v8 }
  0xc7   :  { %v575_v15 = vpop.f32.mrf.mxu0 }
  0xc8   :  { %v1742_v16 = vadd.f32 %v568_v48, %v456_v13  ;;  %v1769_v13 = vld [vmem:[%s1841_s3] ss:$0 sm:$0xff]  ;;  %s1157_s3 = sshll.u32 %s1447_s2, 4  ;;  %s1158_s3 = int_to_ptr.vmem [resolvable:$true] %s1157_s3 }
  0xcb   :  { %v310_v49 = vpop.f32.mrf.mxu2  ;;  %v236_v18 = vpop.f32.mrf.mxu1 }
  0xcc   :  { %v331_v17 = vadd.f32 %v310_v49, %v229_v53  ;;  %v237_v19 = vadd.f32 %v236_v18, %v180_v26 }
  0xcd   :  { %v441_v24 = vpop.f32.mrf.mxu3 }
  0xce   :  { %v457_v7 = vadd.f32 %v436_v11, %v331_v17 }
  0xcf   :  { %v578_v20 = vpop.f32.mrf.mxu0 }
  0xd0   :  { %v1744_v22 = vadd.f32 %v570_v57, %v457_v7 }
  0xd3   :  { %v313_v23 = vpop.f32.mrf.mxu2  ;;  %v238_v28 = vpop.f32.mrf.mxu1 }
  0xd4   :  { %v332_v25 = vadd.f32 %v313_v23, %v232_v3  ;;  %v239_v29 = vadd.f32 %v238_v28, %v182_v37 }
  0xd5   :  { %v444_v1 = vpop.f32.mrf.mxu3 }
  0xd6   :  { %v458_v14 = vadd.f32 %v439_v12, %v332_v25 }
  0xd7   :  { %v580_v30 = vpop.f32.mrf.mxu0 }
  0xd8   :  { %v1746_v31 = vadd.f32 %v573_v0, %v458_v14 }
  0xdb   :  { %v315_v32 = vpop.f32.mrf.mxu2  ;;  %v241_v34 = vpop.f32.mrf.mxu1 }
  0xdc   :  { %v333_v33 = vadd.f32 %v315_v32, %v234_v10  ;;  %v242_v35 = vadd.f32 %v241_v34, %v1701_v5 }
  0xdd   :  { %v446_v26 = vpop.f32.mrf.mxu3 }
  0xde   :  { %v459_v36 = vadd.f32 %v441_v24, %v333_v33 }
  0xdf   :  { %v583_v40 = vpop.f32.mrf.mxu0 }
  0xe0   :  { %v1749_v39 = vadd.f32 %v575_v15, %v459_v36 }
  0xe3   :  { %v318_v42 = vpop.f32.mrf.mxu2  ;;  %v243_v2 = vpop.f32.mrf.mxu1 }
  0xe4   :  { %v334_v43 = vadd.f32 %v318_v42, %v237_v19  ;;  %v244_v37 = vadd.f32 %v243_v2, %v1713_v41 }
  0xe5   :  { %v449_v44 = vpop.f32.mrf.mxu3 }
  0xe6   :  { %v460_v46 = vadd.f32 %v444_v1, %v334_v43 }
  0xe7   :  { %v585_v48 = vpop.f32.mrf.mxu0 }
  0xe8   :  { %v1752_v47 = vadd.f32 %v578_v20, %v460_v46 }
  0xeb   :  { %v320_v62 = vpop.f32.mrf.mxu2  ;;  %v655_v50 = vpop.f32.mrf.mxu1 }
  0xec   :  { %v335_v45 = vadd.f32 %v320_v62, %v239_v29  ;;  %v680_v63 = vadd.f32 %v655_v50, %v1734_v58 }
  0xed   :  { %v451_v51 = vpop.f32.mrf.mxu3 }
  0xee   :  { %v461_v5 = vadd.f32 %v446_v26, %v335_v45 }
  0xef   :  { %v1007_v55 = vpop.f32.mrf.mxu0 }
  0xf0   :  { %v1754_v21 = vadd.f32 %v580_v30, %v461_v5 }
  0xf3   :  { %v323_v52 = vpop.f32.mrf.mxu2  ;;  %v657_v57 = vpop.f32.mrf.mxu1 }
  0xf4   :  { %v336_v53 = vadd.f32 %v323_v52, %v242_v35  ;;  %v681_v49 = vadd.f32 %v657_v57, %v1739_v4 }
  0xf5   :  { %v915_v54 = vpop.f32.mrf.mxu3 }
  0xf6   :  { %v462_v56 = vadd.f32 %v449_v44, %v336_v53 }
  0xf7   :  { %v1009_v3 = vpop.f32.mrf.mxu0 }
  0xf8   :  { %v1756_v59 = vadd.f32 %v583_v40, %v462_v56 }
  0xfb   :  { %v325_v41 = vpop.f32.mrf.mxu2  ;;  %v660_v11 = vpop.f32.mrf.mxu1 }
  0xfc   :  { %v337_v60 = vadd.f32 %v325_v41, %v244_v37  ;;  %v682_v29 = vadd.f32 %v660_v11, %v1742_v16 }
  0xfd   :  { %v917_v61 = vpop.f32.mrf.mxu3 }
  0xfe   :  { %v463_v38 = vadd.f32 %v451_v51, %v337_v60 }
  0xff   :  { %v1012_v15 = vpop.f32.mrf.mxu0 }
 0x100   :  { %v1758_v27 = vadd.f32 %v585_v48, %v463_v38 }
 0x103   :  { %v781_v0 = vpop.f32.mrf.mxu2  ;;  %v662_v17 = vpop.f32.mrf.mxu1 }
 0x104   :  { %v806_v6 = vadd.f32 %v781_v0, %v680_v63  ;;  %v683_v26 = vadd.f32 %v662_v17, %v1744_v22 }
 0x105   :  { %v920_v10 = vpop.f32.mrf.mxu3 }
 0x106   :  { %v940_v8 = vadd.f32 %v915_v54, %v806_v6 }
 0x107   :  { %v1014_v14 = vpop.f32.mrf.mxu0 }
 0x108   :  { %v1032_v12 = vadd.f32 %v1007_v55, %v940_v8 }
 0x10a   :  { %v1046_v58 = vmul.f32 %v1764_v9, %v1032_v12 }
 0x10b   :  { %v783_v18 = vpop.f32.mrf.mxu2  ;;  %v665_v32 = vpop.f32.mrf.mxu1 }
 0x10c   :  { %v1060_v19 = vadd.f32 %v1769_v13, %v1046_v58  ;;  %v807_v24 = vadd.f32 %v783_v18, %v681_v49  ;;  %v684_v5 = vadd.f32 %v665_v32, %v1746_v31 }
 0x10d   :  { %v922_v28 = vpop.f32.mrf.mxu3 }
 0x10e   :  { %v1070_v7 = vmax.f32 %v1060_v19, 0.0  ;;  %v941_v20 = vadd.f32 %v917_v61, %v807_v24 }
 0x10f   :  { %v1017_v37 = vpop.f32.mrf.mxu0 }
 0x110   :  { %v1071_v23 = vpack.c.bf16 %v1070_v7, %v1070_v7  ;;  %v1033_v25 = vadd.f32 %v1009_v3, %v941_v20 }
 0x112   :  { %1073 = vst.msk [vmem:[#allocation5] sm:$0xf] %vm1072_vm7, %v1071_v23  ;;  %v1047_v1 = vmul.f32 %v1764_v9, %v1033_v25 }
 0x113   :  { %v786_v4 = vpop.f32.mrf.mxu2  ;;  %v667_v48 = vpop.f32.mrf.mxu1 }
 0x114   :  { %v808_v30 = vadd.f32 %v786_v4, %v682_v29  ;;  %v1061_v33 = vadd.f32 %v1769_v13, %v1047_v1  ;;  %v685_v6 = vadd.f32 %v667_v48, %v1749_v39 }
 0x115   :  { %v925_v43 = vpop.f32.mrf.mxu3 }
 0x116   :  { %v942_v34 = vadd.f32 %v920_v10, %v808_v30  ;;  %v1074_v36 = vmax.f32 %v1061_v33, 0.0 }
 0x117   :  { %v1019_v38 = vpop.f32.mrf.mxu0 }
 0x118   :  { %v1034_v35 = vadd.f32 %v1012_v15, %v942_v34  ;;  %v1076_v44 = vpack.c.bf16 %v1074_v36, %v1074_v36 }
 0x11a   :  { %v1048_v40 = vmul.f32 %v1764_v9, %v1034_v35  ;;  %v1337_v22 = vrot.slane %v1076_v44, 9 }
 0x11b   :  { %v788_v42 = vpop.f32.mrf.mxu2  ;;  %v670_v63 = vpop.f32.mrf.mxu1 }
 0x11c   :  { %v1062_v16 = vadd.f32 %v1769_v13, %v1048_v40  ;;  %v809_v2 = vadd.f32 %v788_v42, %v683_v26  ;;  %v686_v25 = vadd.f32 %v670_v63, %v1752_v47 }
 0x11d   :  { %v927_v41 = vpop.f32.mrf.mxu3 }
 0x11e   :  { %v1075_v46 = vmax.f32 %v1062_v16, 0.0  ;;  %v943_v62 = vadd.f32 %v922_v28, %v809_v2 }
 0x11f   :  { %v1022_v20 = vpop.f32.mrf.mxu0 }
 0x120   :  { %v1077_v45 = vpack.c.bf16 %v1075_v46, %v1075_v46  ;;  %v1035_v50 = vadd.f32 %v1014_v14, %v943_v62 }
 0x122   :  { %v1085_v52 = vrot.slane %v1077_v45, 5  ;;  %v1049_v53 = vmul.f32 %v1764_v9, %v1035_v50  ;;  %v1338_v0 = vrot.slane %v1077_v45, 10 }
 0x123   :  { %v791_v54 = vpop.f32.mrf.mxu2  ;;  %v672_v1 = vpop.f32.mrf.mxu1 }
 0x124   :  { %v1086_v55 = vsel %vm1781_vm10, %v1337_v22, %v1085_v52  ;;  %v1063_v56 = vadd.f32 %v1769_v13, %v1049_v53  ;;  %v810_v57 = vadd.f32 %v791_v54, %v684_v5  ;;  %v687_v47 = vadd.f32 %v672_v1, %v1754_v21 }
 0x125   :  { %1089 = vst.msk [vmem:[#allocation5 + $0x4] sm:$0xf] %vm1072_vm7, %v1086_v55  ;;  %v930_v19 = vpop.f32.mrf.mxu3 }
 0x126   :  { %v1090_v60 = vmax.f32 %v1063_v56, 0.0  ;;  %v944_v61 = vadd.f32 %v925_v43, %v810_v57 }
 0x127   :  { %v1024_v42 = vpop.f32.mrf.mxu0 }
 0x128   :  { %v1091_v3 = vpack.c.bf16 %v1090_v60, %v1090_v60  ;;  %v1036_v31 = vadd.f32 %v1017_v37, %v944_v61 }
 0x12a   :  { %v1098_v8 = vrot.slane %v1091_v3, 6  ;;  %v1050_v10 = vmul.f32 %v1764_v9, %v1036_v31  ;;  %v1339_v23 = vrot.slane %v1091_v3, 11 }
 0x12b   :  { %v793_v12 = vpop.f32.mrf.mxu2  ;;  %v675_v2 = vpop.f32.mrf.mxu1 }
 0x12c   :  { %v1099_v15 = vsel %vm1791_vm13, %v1338_v0, %v1098_v8  ;;  %v1064_v49 = vadd.f32 %v1769_v13, %v1050_v10  ;;  %v811_v58 = vadd.f32 %v793_v12, %v685_v6  ;;  %v688_v62 = vadd.f32 %v675_v2, %v1756_v59 }
 0x12d   :  { %1102 = vst.msk [vmem:[#allocation5 + $0x8] sm:$0xf] %vm1072_vm7, %v1099_v15  ;;  %v932_v36 = vpop.f32.mrf.mxu3 }
 0x12e   :  { %v1103_v17 = vmax.f32 %v1064_v49, 0.0  ;;  %v945_v18 = vadd.f32 %v927_v41, %v811_v58 }
 0x12f   :  { %v1027_v52 = vpop.f32.mrf.mxu0 }
 0x130   :  { %v1104_v24 = vpack.c.bf16 %v1103_v17, %v1103_v17  ;;  %v1037_v7 = vadd.f32 %v1019_v38, %v945_v18 }
 0x132   :  { %v1111_v28 = vrot.slane %v1104_v24, 7  ;;  %v1051_v29 = vmul.f32 %v1764_v9, %v1037_v7 }
 0x133   :  { %v796_v4 = vpop.f32.mrf.mxu2  ;;  %v677_v56 = vpop.f32.mrf.mxu1 }
 0x134   :  { %v1112_v14 = vsel %vm1801_vm0, %v1339_v23, %v1111_v28  ;;  %v1065_v30 = vadd.f32 %v1769_v13, %v1051_v29  ;;  %v812_v32 = vadd.f32 %v796_v4, %v686_v25  ;;  %v689_v61 = vadd.f32 %v677_v56, %v1758_v27 }
 0x135   :  { %1115 = vst.msk [vmem:[#allocation5 + $0xc] sm:$0xf] %vm1072_vm7, %v1112_v14  ;;  %v935_v50 = vpop.f32.mrf.mxu3 }
 0x136   :  { %v1116_v33 = vmax.f32 %v1065_v30, 0.0  ;;  %v946_v34 = vadd.f32 %v930_v19, %v812_v32 }
 0x137   :  { %v1029_v12 = vpop.f32.mrf.mxu0 }
 0x138   :  { %v1117_v35 = vpack.c.bf16 %v1116_v33, %v1116_v33  ;;  %v1038_v26 = vadd.f32 %v1022_v20, %v946_v34 }
 0x13a   :  { %1119 = vst.msk [vmem:[#allocation5 + $0x10] sm:$0xf] %vm1072_vm7, %v1117_v35  ;;  %v1052_v40 = vmul.f32 %v1764_v9, %v1038_v26 }
 0x13b   :  { %v798_v43 = vpop.f32.mrf.mxu2 }
 0x13c   :  { %v813_v16 = vadd.f32 %v798_v43, %v687_v47  ;;  %v1066_v37 = vadd.f32 %v1769_v13, %v1052_v40 }
 0x13d   :  { %v937_v6 = vpop.f32.mrf.mxu3 }
 0x13e   :  { %v947_v44 = vadd.f32 %v932_v36, %v813_v16  ;;  %v1120_v48 = vmax.f32 %v1066_v37, 0.0 }
 0x140   :  { %v1039_v46 = vadd.f32 %v1024_v42, %v947_v44  ;;  %v1122_v53 = vpack.c.bf16 %v1120_v48, %v1120_v48 }
 0x142   :  { %v1053_v45 = vmul.f32 %v1764_v9, %v1039_v46  ;;  %v1340_v60 = vrot.slane %v1122_v53, 9 }
 0x143   :  { %v801_v22 = vpop.f32.mrf.mxu2 }
 0x144   :  { %v1067_v21 = vadd.f32 %v1769_v13, %v1053_v45  ;;  %v814_v5 = vadd.f32 %v801_v22, %v688_v62 }
 0x146   :  { %v1121_v54 = vmax.f32 %v1067_v21, 0.0  ;;  %v948_v55 = vadd.f32 %v935_v50, %v814_v5 }
 0x148   :  { %v1123_v57 = vpack.c.bf16 %v1121_v54, %v1121_v54  ;;  %v1040_v41 = vadd.f32 %v1027_v52, %v948_v55 }
 0x14a   :  { %v1128_v38 = vrot.slane %v1123_v57, 5  ;;  %v1054_v59 = vmul.f32 %v1764_v9, %v1040_v41  ;;  %v1341_v58 = vrot.slane %v1123_v57, 10 }
 0x14b   :  { %v803_v3 = vpop.f32.mrf.mxu2 }
 0x14c   :  { %v1129_v31 = vsel %vm1781_vm10, %v1340_v60, %v1128_v38  ;;  %v1068_v63 = vadd.f32 %v1769_v13, %v1054_v59  ;;  %v815_v0 = vadd.f32 %v803_v3, %v689_v61 }
 0x14d   :  { %1132 = vst.msk [vmem:[#allocation5 + $0x14] sm:$0xf] %vm1072_vm7, %v1129_v31 }
 0x14e   :  { %v1133_v8 = vmax.f32 %v1068_v63, 0.0  ;;  %v949_v10 = vadd.f32 %v937_v6, %v815_v0 }
 0x150   :  { %v1134_v15 = vpack.c.bf16 %v1133_v8, %v1133_v8  ;;  %v1041_v49 = vadd.f32 %v1029_v12, %v949_v10 }
 0x152   :  { %v1138_v27 = vrot.slane %v1134_v15, 6  ;;  %v1055_v17 = vmul.f32 %v1764_v9, %v1041_v49  ;;  %v1342_v7 = vrot.slane %v1134_v15, 11 }
 0x154   :  { %v1139_v18 = vsel %vm1791_vm13, %v1341_v58, %v1138_v27  ;;  %v1069_v51 = vadd.f32 %v1769_v13, %v1055_v17 }
 0x155   :  { %1142 = vst.msk [vmem:[#allocation5 + $0x18] sm:$0xf] %vm1072_vm7, %v1139_v18 }
 0x156   :  { %v1143_v19 = vmax.f32 %v1069_v51, 0.0 }
 0x158   :  { %v1144_v24 = vpack.c.bf16 %v1143_v19, %v1143_v19 }
 0x15a   :  { %v1148_v20 = vrot.slane %v1144_v24, 7 }
 0x15c   :  { %v1149_v9 = vsel %vm1801_vm0, %v1342_v7, %v1148_v20 }
 0x15d   :  { %1152 = vst.msk [vmem:[#allocation5 + $0x1c] sm:$0xf] %vm1072_vm7, %v1149_v9 }
 0x15e   :  { %1165 = dma.vmem_to_hbm [thread:$0]  %s1158_s3, 512, %s1160_s26, [#allocation4], %s1445_s20, %s1445_s20, %s1446_s21  }
 0x15f   :  { %1442 = dma.done.wait [#allocation4], 512  }
 0x160   :  { %1443 = vsyncadd [#allocation4], 4294966784 }
 0x161   :  { %1170 = vsyncpa [#allocation3], 1 }
 0x162   :  { %1171 = vsyncpa [#allocation4], 1 }

</bundles_post_ra>
